<compile_context>
chip_gen: v7x
topology: tpu7x:2x2x1
jax: 0.10.0
libtpu: 0.0.40
codegen_flags: <defaults>
</compile_context>

<pallas_src>
import functools

import jax
import jax.numpy as jnp
from jax.experimental import pallas as pl
from jax.experimental.pallas import tpu as pltpu


# -----------------------------------------------------------------------------
# Kernel: whole backbone for NB images per grid step, fully VMEM-resident
# -----------------------------------------------------------------------------
def _resnet_bottom_kernel(x_ref, w_ref, b_ref, s_ref, o_ref):
    """Fused stem + residual block + global-average-pool for NB images.

    x_ref  (NB, H, WC)     lane-dense activations, WC = W * Cpad = 128
    w_ref  (3, 3*WC, WC)   per-layer fused-K conv matrices (BN scale folded);
                           K blocks stacked in dy order [up, mid, down]
    b_ref  (3, 1, WC)      per-layer folded BN bias, tiled across W
    s_ref  (WC, WC)        0/1 W-summing matrix with 1/(H*W) folded in (GAP)
    o_ref  (NB, 1, WC)     pooled features; channels live in lanes [0, C)
    """
    nb, h, wc = x_ref.shape
    rows = nb * h
    x = x_ref[...].reshape(rows, wc)

    # Per-image row index (0..h-1) for every row of the batched block, used to
    # zero the dy = +/-1 neighbours at image boundaries.
    r = jax.lax.broadcasted_iota(jnp.int32, (rows, wc), 0)
    if h & (h - 1) == 0:                       # h power of two: cheap bit-mod
        rm = jnp.bitwise_and(r, h - 1)
    else:
        rm = jax.lax.rem(r, jnp.int32(h))
    top = rm == 0
    bot = rm == h - 1

    def conv_bn_relu(a, layer, residual=None):
        # dy = +/-1 rows via XLU rolls (free slot) + boundary masks (VPU);
        # no VMEM scratch round trip.
        up = jnp.where(top, 0.0, pltpu.roll(a, shift=1, axis=0))
        dn = jnp.where(bot, 0.0, pltpu.roll(a, shift=rows - 1, axis=0))
        # One fused K = 3*WC matmul per layer.
        lhs = jnp.concatenate([up, a, dn], axis=1)            # (rows, 3*WC)
        acc = jnp.dot(lhs, w_ref[layer],
                      preferred_element_type=jnp.float32)     # (rows, WC)
        acc = acc + b_ref[layer]                               # folded BN bias
        if residual is not None:
            acc = acc + residual
        return jnp.maximum(acc, 0.0)

    a1 = conv_bn_relu(x, 0)                 # stem: conv + BN + ReLU
    a2 = conv_bn_relu(a1, 1)                # block conv1
    a3 = conv_bn_relu(a2, 2, residual=a1)   # block conv2 + skip + ReLU

    # Global average pool, fully in-kernel: H-sum per image (sublane reduce)
    # then W-sum + scale as one MXU matmul, keeping the store 128-lane dense.
    hsum = jnp.sum(a3.reshape(nb, h, wc), axis=1)              # (NB, WC)
    gap = jnp.dot(hsum, s_ref[...], preferred_element_type=jnp.float32)
    o_ref[...] = gap.reshape(nb, 1, wc)


# -----------------------------------------------------------------------------
# Wrapper
# -----------------------------------------------------------------------------
def _pick_batch_block(n, cap=16):
    """Largest divisor of n that keeps >= 2 grid steps (v7x has 2 TCs/chip)."""
    target = min(max(n // 2, 1), cap)
    for nb in range(target, 0, -1):
        if n % nb == 0:
            return nb
    return 1


def resnet_bottom_forward(x_nchw, prep):
    """ResNetBottom.forward: feature extractor + flatten(1) -> (N, C_out)."""
    wmats = prep["w"]            # (3, 3*WC, WC)
    brows = prep["b"]            # (3, 1, WC)
    smat = prep["s"]             # (WC, WC)
    n, cin, h, w = x_nchw.shape
    wc = wmats.shape[-1]
    cpad = wc // w               # channels padded up to C_out
    assert wmats.shape[-2] == 3 * wc and wc == w * cpad

    nb = _pick_batch_block(n)

    # NCHW -> NHWC, pad input channels to cpad, fold (W, C) into the lane dim.
    x = jnp.transpose(x_nchw, (0, 2, 3, 1)).astype(jnp.float32)
    x = jnp.pad(x, ((0, 0), (0, 0), (0, 0), (0, cpad - cin)))
    x = x.reshape(n, h, wc)

    pooled = pl.pallas_call(
        _resnet_bottom_kernel,
        out_shape=jax.ShapeDtypeStruct((n, 1, wc), jnp.float32),
        grid=(n // nb,),
        in_specs=[
            pl.BlockSpec((nb, h, wc), lambda i: (i, 0, 0)),
            pl.BlockSpec(wmats.shape, lambda i: (0, 0, 0)),   # resident weights
            pl.BlockSpec(brows.shape, lambda i: (0, 0, 0)),
            pl.BlockSpec(smat.shape, lambda i: (0, 0)),
        ],
        out_specs=pl.BlockSpec((nb, 1, wc), lambda i: (i, 0, 0)),
        compiler_params=pltpu.CompilerParams(
            dimension_semantics=("parallel",)),
    )(x, wmats, brows, smat)

    # Everything (conv/BN/ReLU/residual/GAP/scale) done in-kernel; only a
    # slice of the lane-dense result remains here.
    return pooled.reshape(n, wc)[:, :cpad]


# -----------------------------------------------------------------------------
# Parameters (deterministic, synthetic) & one-time folding
# -----------------------------------------------------------------------------
def _fold_bn(gamma, beta, mean, var, eps=1e-5):
    scale = gamma / jnp.sqrt(var + eps)
    bias = beta - mean * scale
    return scale, bias


def init_params(key, cin=3, c=8):
    ks = jax.random.split(key, 9)

    def conv_w(k, ci, co):
        return 0.1 * jax.random.normal(k, (3, 3, ci, co), jnp.float32)

    def bn(k1, k2, co):
        gamma = 1.0 + 0.1 * jax.random.normal(k1, (co,), jnp.float32)
        beta = 0.1 * jax.random.normal(k2, (co,), jnp.float32)
        mean = jnp.zeros((co,), jnp.float32)
        var = jnp.ones((co,), jnp.float32)
        return _fold_bn(gamma, beta, mean, var)

    p = {}
    p["stem_w"] = conv_w(ks[0], cin, c)
    p["stem_s"], p["stem_b"] = bn(ks[1], ks[2], c)
    p["c1_w"] = conv_w(ks[3], c, c)
    p["c1_s"], p["c1_b"] = bn(ks[4], ks[5], c)
    p["c2_w"] = conv_w(ks[6], c, c)
    p["c2_s"], p["c2_b"] = bn(ks[7], ks[8], c)
    return p


def prepare_params(params, *, width=16, height=16):
    """One-time fold: conv kernels (+ BN scale) -> fused-K row matrices.

    For a lane-dense activation row x[h] of length W*Cin, the dy-th row
    contribution of a 3x3 same-padded conv is x[h+dy-1] @ M[dy] with
        M[dy][w_in*Cin + ci, w_out*Cout + co] = K[dy, w_in-w_out+1, ci, co]
    (zero outside |dx| <= 1).  The three M[dy] are stacked along K so each
    layer is a single (rows, 3*WC) x (3*WC, WC) matmul.
    """
    w = width
    cout = params["stem_w"].shape[-1]
    cpad = cout  # pad every layer's Cin up to Cout so all layers share shapes

    # selector[dx, w_in, w_out] = 1 iff w_in == w_out + dx - 1   (exact 0/1)
    d = jnp.arange(3).reshape(3, 1, 1)
    a = jnp.arange(w).reshape(1, w, 1)
    wo = jnp.arange(w).reshape(1, 1, w)
    sel = (a == wo + d - 1).astype(jnp.float32)          # (3, W, W)

    def layer_mats(kern, scale):
        k = kern * scale[None, None, None, :]            # fold BN scale
        ci = k.shape[2]
        if ci < cpad:
            k = jnp.pad(k, ((0, 0), (0, 0), (0, cpad - ci), (0, 0)))
        # m[dy, w_in, ci, w_out, co] = sum_dx k[dy, dx, ci, co] * sel[dx, w_in, w_out]
        m = jnp.sum(k[:, :, None, :, None, :] * sel[None, :, :, None, :, None],
                    axis=1)                               # (3, W, cpad, W, cout)
        # Stack dy blocks along K -> (3*W*cpad, W*cout).
        return m.reshape(3 * w * cpad, w * cout)

    wm = jnp.stack([layer_mats(params["stem_w"], params["stem_s"]),
                    layer_mats(params["c1_w"], params["c1_s"]),
                    layer_mats(params["c2_w"], params["c2_s"])], axis=0)
    br = jnp.stack([jnp.tile(params["stem_b"], w),
                    jnp.tile(params["c1_b"], w),
                    jnp.tile(params["c2_b"], w)], axis=0).reshape(3, 1, w * cout)

    # GAP W-summing matrix: row (w_in*cpad + ci) -> column ci, 1/(H*W) folded.
    smat = jnp.tile(jnp.eye(cpad, dtype=jnp.float32), (w, 1))   # (W*cpad, cpad)
    smat = jnp.pad(smat, ((0, 0), (0, w * cpad - cpad))) * (1.0 / (height * w))

    return {"w": wm.astype(jnp.float32), "b": br.astype(jnp.float32),
            "s": smat.astype(jnp.float32)}


# -----------------------------------------------------------------------------
# Pure-JAX reference (correctness check only)
# -----------------------------------------------------------------------------
def _im2col_3x3(x_nhwc):
    n, h, w, c = x_nhwc.shape
    xp = jnp.pad(x_nhwc, ((0, 0), (1, 1), (1, 1), (0, 0)))
    patches = [xp[:, dy:dy + h, dx:dx + w, :] for dy in range(3) for dx in range(3)]
    return jnp.concatenate(patches, axis=-1).reshape(n * h * w, 9 * c)


def _ref_conv(x_nhwc, w, scale, bias, residual=None):
    cols = _im2col_3x3(x_nhwc)
    n, h, wd, cin = x_nhwc.shape
    cout = w.shape[-1]
    out = jnp.matmul(cols, w.reshape(9 * cin, cout),
                     precision=jax.lax.Precision.HIGHEST)
    out = out * scale[None, :] + bias[None, :]
    if residual is not None:
        out = out + residual.reshape(-1, cout)
    return jnp.maximum(out, 0.0).reshape(n, h, wd, cout)


def _ref_forward(x_nchw, p):
    x = jnp.transpose(x_nchw, (0, 2, 3, 1)).astype(jnp.float32)
    x = _ref_conv(x, p["stem_w"], p["stem_s"], p["stem_b"])
    y = _ref_conv(x, p["c1_w"], p["c1_s"], p["c1_b"])
    y = _ref_conv(y, p["c2_w"], p["c2_s"], p["c2_b"], residual=x)
    return jnp.mean(y, axis=(1, 2))


# -----------------------------------------------------------------------------
if __name__ == "__main__":
    key = jax.random.PRNGKey(0)
    k_x, k_p = jax.random.split(key)

    # N=4 images (2 per grid step -> 2 steps, so both v7x TensorCores get work),
    # 3 input channels, 16x16 spatial (W * Cpad = 128 -> lane-dense rows).
    x = jax.random.normal(k_x, (4, 3, 16, 16), jnp.float32)
    params = init_params(k_p)
    prep = prepare_params(params, width=16, height=16)

    fwd = jax.jit(functools.partial(resnet_bottom_forward, prep=prep))
    out = jax.block_until_ready(fwd(x))

    ref = _ref_forward(x, params)
    assert out.shape == (4, 8), out.shape
    err = float(jnp.max(jnp.abs(out - ref)))
    assert jnp.allclose(out, ref, rtol=1e-3, atol=1e-3), err
    print("KERNEL_OK")
</pallas_src>

<mosaic_0001>
module attributes {stable_mosaic.version = 11 : i64} {
  func.func @_resnet_bottom_kernel(%arg0: i32, %arg1: memref<2x16x128xf32, #tpu.memory_space<vmem>>, %arg2: memref<3x384x128xf32, #tpu.memory_space<vmem>>, %arg3: memref<3x1x128xf32, #tpu.memory_space<vmem>>, %arg4: memref<128x128xf32, #tpu.memory_space<vmem>>, %arg5: memref<2x1x128xf32, #tpu.memory_space<vmem>>) attributes {dimension_semantics = [#tpu.dimension_semantics<parallel>], iteration_bounds = array<i64: 2>, scalar_prefetch = 0 : i64, scratch_operands = 0 : i64, tpu.core_type = #tpu.core_type<tc>, window_params = [{transform_indices = @transform_0, window_bounds = array<i64: 2, 16, 128>}, {pipeline_mode = #tpu.pipeline_mode<synchronous>, transform_indices = @transform_1, window_bounds = array<i64: 3, 384, 128>}, {pipeline_mode = #tpu.pipeline_mode<synchronous>, transform_indices = @transform_2, window_bounds = array<i64: 3, 1, 128>}, {pipeline_mode = #tpu.pipeline_mode<synchronous>, transform_indices = @transform_3, window_bounds = array<i64: 128, 128>}, {transform_indices = @transform_4, window_bounds = array<i64: 2, 1, 128>}]} {
    %c0 = arith.constant 0 : index
    %c0_0 = arith.constant 0 : index
    %c0_1 = arith.constant 0 : index
    %0 = vector.load %arg1[%c0, %c0_0, %c0_1] : memref<2x16x128xf32, #tpu.memory_space<vmem>>, vector<2x16x128xf32>
    %1 = vector.shape_cast %0 : vector<2x16x128xf32> to vector<32x128xf32>
    %2 = tpu.iota {dimensions = array<i32: 0>} : vector<32x128xi32>
    %c15_i32 = arith.constant 15 : i32
    %3 = vector.broadcast %c15_i32 : i32 to vector<32x128xi32>
    %4 = arith.andi %2, %3 : vector<32x128xi32>
    %c0_i32 = arith.constant 0 : i32
    %5 = vector.broadcast %c0_i32 : i32 to vector<32x128xi32>
    %6 = arith.cmpi eq, %4, %5 : vector<32x128xi32>
    %c15_i32_2 = arith.constant 15 : i32
    %7 = vector.broadcast %c15_i32_2 : i32 to vector<32x128xi32>
    %8 = arith.cmpi eq, %4, %7 : vector<32x128xi32>
    %c1_i32 = arith.constant 1 : i32
    %9 = tpu.dynamic_rotate %1 by %c1_i32 dim 0 : vector<32x128xf32>, i32 -> vector<32x128xf32>
    %cst = arith.constant 0.000000e+00 : f32
    %10 = vector.broadcast %cst : f32 to vector<32x128xf32>
    %11 = arith.select %6, %10, %9 : vector<32x128xi1>, vector<32x128xf32>
    %c31_i32 = arith.constant 31 : i32
    %12 = tpu.dynamic_rotate %1 by %c31_i32 dim 0 : vector<32x128xf32>, i32 -> vector<32x128xf32>
    %cst_3 = arith.constant 0.000000e+00 : f32
    %13 = vector.broadcast %cst_3 : f32 to vector<32x128xf32>
    %14 = arith.select %8, %13, %12 : vector<32x128xi1>, vector<32x128xf32>
    %15 = tpu.concatenate %11, %1, %14 in 1 : vector<32x128xf32>, vector<32x128xf32>, vector<32x128xf32> -> vector<32x384xf32>
    %c0_4 = arith.constant 0 : index
    %c0_5 = arith.constant 0 : index
    %c0_6 = arith.constant 0 : index
    %16 = vector.load %arg2[%c0_4, %c0_5, %c0_6] : memref<3x384x128xf32, #tpu.memory_space<vmem>>, vector<1x384x128xf32>
    %17 = vector.shape_cast %16 : vector<1x384x128xf32> to vector<384x128xf32>
    %cst_7 = arith.constant dense<0.000000e+00> : vector<32x128xf32>
    %18 = tpu.matmul %15, %17, %cst_7 {dimension_numbers = #tpu.dot_dimension_numbers<[1], [0], [0], [1], [0, 0, 1, 1], [], []>} : vector<32x384xf32>, vector<384x128xf32>, vector<32x128xf32> -> vector<32x128xf32>
    %c0_8 = arith.constant 0 : index
    %c0_9 = arith.constant 0 : index
    %c0_10 = arith.constant 0 : index
    %19 = vector.load %arg3[%c0_8, %c0_9, %c0_10] : memref<3x1x128xf32, #tpu.memory_space<vmem>>, vector<1x1x128xf32>
    %20 = vector.shape_cast %19 : vector<1x1x128xf32> to vector<1x128xf32>
    %21 = vector.broadcast %20 : vector<1x128xf32> to vector<32x128xf32>
    %22 = arith.addf %18, %21 : vector<32x128xf32>
    %cst_11 = arith.constant 0.000000e+00 : f32
    %23 = vector.broadcast %cst_11 : f32 to vector<32x128xf32>
    %24 = arith.maximumf %22, %23 : vector<32x128xf32>
    %c1_i32_12 = arith.constant 1 : i32
    %25 = tpu.dynamic_rotate %24 by %c1_i32_12 dim 0 : vector<32x128xf32>, i32 -> vector<32x128xf32>
    %cst_13 = arith.constant 0.000000e+00 : f32
    %26 = vector.broadcast %cst_13 : f32 to vector<32x128xf32>
    %27 = arith.select %6, %26, %25 : vector<32x128xi1>, vector<32x128xf32>
    %c31_i32_14 = arith.constant 31 : i32
    %28 = tpu.dynamic_rotate %24 by %c31_i32_14 dim 0 : vector<32x128xf32>, i32 -> vector<32x128xf32>
    %cst_15 = arith.constant 0.000000e+00 : f32
    %29 = vector.broadcast %cst_15 : f32 to vector<32x128xf32>
    %30 = arith.select %8, %29, %28 : vector<32x128xi1>, vector<32x128xf32>
    %31 = tpu.concatenate %27, %24, %30 in 1 : vector<32x128xf32>, vector<32x128xf32>, vector<32x128xf32> -> vector<32x384xf32>
    %c1 = arith.constant 1 : index
    %c0_16 = arith.constant 0 : index
    %c0_17 = arith.constant 0 : index
    %32 = vector.load %arg2[%c1, %c0_16, %c0_17] : memref<3x384x128xf32, #tpu.memory_space<vmem>>, vector<1x384x128xf32>
    %33 = vector.shape_cast %32 : vector<1x384x128xf32> to vector<384x128xf32>
    %cst_18 = arith.constant dense<0.000000e+00> : vector<32x128xf32>
    %34 = tpu.matmul %31, %33, %cst_18 {dimension_numbers = #tpu.dot_dimension_numbers<[1], [0], [0], [1], [0, 0, 1, 1], [], []>} : vector<32x384xf32>, vector<384x128xf32>, vector<32x128xf32> -> vector<32x128xf32>
    %c1_19 = arith.constant 1 : index
    %c0_20 = arith.constant 0 : index
    %c0_21 = arith.constant 0 : index
    %35 = vector.load %arg3[%c1_19, %c0_20, %c0_21] : memref<3x1x128xf32, #tpu.memory_space<vmem>>, vector<1x1x128xf32>
    %36 = vector.shape_cast %35 : vector<1x1x128xf32> to vector<1x128xf32>
    %37 = vector.broadcast %36 : vector<1x128xf32> to vector<32x128xf32>
    %38 = arith.addf %34, %37 : vector<32x128xf32>
    %cst_22 = arith.constant 0.000000e+00 : f32
    %39 = vector.broadcast %cst_22 : f32 to vector<32x128xf32>
    %40 = arith.maximumf %38, %39 : vector<32x128xf32>
    %c1_i32_23 = arith.constant 1 : i32
    %41 = tpu.dynamic_rotate %40 by %c1_i32_23 dim 0 : vector<32x128xf32>, i32 -> vector<32x128xf32>
    %cst_24 = arith.constant 0.000000e+00 : f32
    %42 = vector.broadcast %cst_24 : f32 to vector<32x128xf32>
    %43 = arith.select %6, %42, %41 : vector<32x128xi1>, vector<32x128xf32>
    %c31_i32_25 = arith.constant 31 : i32
    %44 = tpu.dynamic_rotate %40 by %c31_i32_25 dim 0 : vector<32x128xf32>, i32 -> vector<32x128xf32>
    %cst_26 = arith.constant 0.000000e+00 : f32
    %45 = vector.broadcast %cst_26 : f32 to vector<32x128xf32>
    %46 = arith.select %8, %45, %44 : vector<32x128xi1>, vector<32x128xf32>
    %47 = tpu.concatenate %43, %40, %46 in 1 : vector<32x128xf32>, vector<32x128xf32>, vector<32x128xf32> -> vector<32x384xf32>
    %c2 = arith.constant 2 : index
    %c0_27 = arith.constant 0 : index
    %c0_28 = arith.constant 0 : index
    %48 = vector.load %arg2[%c2, %c0_27, %c0_28] : memref<3x384x128xf32, #tpu.memory_space<vmem>>, vector<1x384x128xf32>
    %49 = vector.shape_cast %48 : vector<1x384x128xf32> to vector<384x128xf32>
    %cst_29 = arith.constant dense<0.000000e+00> : vector<32x128xf32>
    %50 = tpu.matmul %47, %49, %cst_29 {dimension_numbers = #tpu.dot_dimension_numbers<[1], [0], [0], [1], [0, 0, 1, 1], [], []>} : vector<32x384xf32>, vector<384x128xf32>, vector<32x128xf32> -> vector<32x128xf32>
    %c2_30 = arith.constant 2 : index
    %c0_31 = arith.constant 0 : index
    %c0_32 = arith.constant 0 : index
    %51 = vector.load %arg3[%c2_30, %c0_31, %c0_32] : memref<3x1x128xf32, #tpu.memory_space<vmem>>, vector<1x1x128xf32>
    %52 = vector.shape_cast %51 : vector<1x1x128xf32> to vector<1x128xf32>
    %53 = vector.broadcast %52 : vector<1x128xf32> to vector<32x128xf32>
    %54 = arith.addf %50, %53 : vector<32x128xf32>
    %55 = arith.addf %54, %24 : vector<32x128xf32>
    %cst_33 = arith.constant 0.000000e+00 : f32
    %56 = vector.broadcast %cst_33 : f32 to vector<32x128xf32>
    %57 = arith.maximumf %55, %56 : vector<32x128xf32>
    %58 = vector.shape_cast %57 : vector<32x128xf32> to vector<2x16x128xf32>
    %cst_34 = arith.constant dense<0.000000e+00> : vector<2x128xf32>
    %59 = vector.multi_reduction <add>, %58, %cst_34 [1] : vector<2x16x128xf32> to vector<2x128xf32>
    %c0_35 = arith.constant 0 : index
    %c0_36 = arith.constant 0 : index
    %60 = vector.load %arg4[%c0_35, %c0_36] : memref<128x128xf32, #tpu.memory_space<vmem>>, vector<128x128xf32>
    %cst_37 = arith.constant dense<0.000000e+00> : vector<2x128xf32>
    %61 = tpu.matmul %59, %60, %cst_37 {dimension_numbers = #tpu.dot_dimension_numbers<[1], [0], [0], [1], [0, 0, 1, 1], [], []>} : vector<2x128xf32>, vector<128x128xf32>, vector<2x128xf32> -> vector<2x128xf32>
    %62 = vector.shape_cast %61 : vector<2x128xf32> to vector<2x1x128xf32>
    %c0_38 = arith.constant 0 : index
    %c0_39 = arith.constant 0 : index
    %c0_40 = arith.constant 0 : index
    %63 = vector.load %arg5[%c0_38, %c0_39, %c0_40] : memref<2x1x128xf32, #tpu.memory_space<vmem>>, vector<2x1x128xf32>
    tpu.vector_store %arg5[%c0_38, %c0_39, %c0_40], %62 {strides = array<i32>} : memref<2x1x128xf32, #tpu.memory_space<vmem>>, vector<2x1x128xf32>,
    return
  }
  func.func @transform_0(%arg0: i32) -> (i32, i32, i32) {
    %c0_i32 = arith.constant 0 : i32
    %c0_i32_0 = arith.constant 0 : i32
    %c0_i32_1 = arith.constant 0 : i32
    return %arg0, %c0_i32, %c0_i32_0 : i32, i32, i32
  }
  func.func @transform_1(%arg0: i32) -> (i32, i32, i32) {
    %c0_i32 = arith.constant 0 : i32
    %c0_i32_0 = arith.constant 0 : i32
    %c0_i32_1 = arith.constant 0 : i32
    %c0_i32_2 = arith.constant 0 : i32
    return %c0_i32, %c0_i32_0, %c0_i32_1 : i32, i32, i32
  }
  func.func @transform_2(%arg0: i32) -> (i32, i32, i32) {
    %c0_i32 = arith.constant 0 : i32
    %c0_i32_0 = arith.constant 0 : i32
    %c0_i32_1 = arith.constant 0 : i32
    %c0_i32_2 = arith.constant 0 : i32
    return %c0_i32, %c0_i32_0, %c0_i32_1 : i32, i32, i32
  }
  func.func @transform_3(%arg0: i32) -> (i32, i32) {
    %c0_i32 = arith.constant 0 : i32
    %c0_i32_0 = arith.constant 0 : i32
    %c0_i32_1 = arith.constant 0 : i32
    return %c0_i32, %c0_i32_0 : i32, i32
  }
  func.func @transform_4(%arg0: i32) -> (i32, i32, i32) {
    %c0_i32 = arith.constant 0 : i32
    %c0_i32_0 = arith.constant 0 : i32
    %c0_i32_1 = arith.constant 0 : i32
    return %arg0, %c0_i32, %c0_i32_0 : i32, i32, i32
  }
}

</mosaic_0001>

<bundles_post_ra>
// kernel: resnet_bottom_forward.1
= control target key start
LH: loop header
LB: loop body
LE: loop exit
PB: predicated region body
PF: predicated region fallthrough
CT: control target
= control target key end

     0   :  { %9 = vsyncpa [#allocation3], 0  ;;  %s2817_s0 = inlined_call_operand.vmem [shape: f32[4,16,128], index: 0, kind: input, shape index: {}]   ;;  %s2818_s1 = inlined_call_operand.vmem [shape: f32[3,384,128], index: 1, kind: input, shape index: {}]   ;;  %s2819_s2 = inlined_call_operand.vmem [shape: f32[3,1,128], index: 2, kind: input, shape index: {}]   ;;  %s2820_s3 = inlined_call_operand.vmem [shape: f32[128,128], index: 3, kind: input, shape index: {}]   ;;  %s2821_s4 = inlined_call_operand.hbm [shape: f32[4,1,128], index: 4, kind: output, shape index: {}]  }
   0x1   :  { %11 = vsyncpa [#allocation3 + $0x1], 0  ;;  %s2061_s15 = smov 0   ;;  %s2063_s16 = smov 0  }
   0x2   :  { %s2065_s17 = smov 0   ;;  %s2067_s18 = smov 0  }
   0x3 LB: > { %s2082_s19 = sadd.s32 4294967295, %s2027_s18   ;;  %s1200_s20 = sadd.s32 4294967294, %s2027_s18   ;;  %s2027_s18 = sphi %s2067_s18, %s2836_s18   ;;  %s2023_s17 = sphi %s2065_s17, %s2835_s17   ;;  %s2019_s16 = sphi %s2063_s16, %s2834_s16   ;;  %s2015_s15 = sphi %s2061_s15, %s2833_s15  }
   0x4   : > { %s2086_s21 = sadd.s32 1, %s2027_s18   ;;  %s113_s22 = sadd.s32 1, %s2023_s17 }
   0x5   : > { %s110_s23 = ssub.s32 %s2027_s18, %s2086_s21  ;;  %p123_p0 = scmp.ne.s32.totalorder %s2023_s17, %s2019_s16 }
   0x6   : > { %p111_p1 = scmp.eq.s32.totalorder %s110_s23, 0  ;;  %p124_p2 = scmp.eq.s32.totalorder %s2082_s19, 1 }
   0x7   : > { %p129_p3 = scmp.ne.s32.totalorder %s2019_s16, %s2015_s15  ;;  %p130_p4 = scmp.eq.s32.totalorder %s1200_s20, 1 }
   0x8   : > { %s2097_s24 = scalar_select %p111_p1, %s2023_s17, %s113_s22  }
   0x9   : > { %p2099_p5 = por %p124_p2, %p123_p0  ;;  %p2103_p6 = por %p130_p4, %p129_p3 }
   0xa   : > { %p1203_p7 = scmp.ge.s32.totalorder %s2027_s18, 1  ;;  %p167_p8 = scmp.lt.s32.totalorder %s2027_s18, 3 }
   0xc   : > { %p168_p9 = pnand %p1203_p7, %p167_p8 }
   0xd   : > { %v265_v0 = vld [vmem:[%s2818_s1 + $0x80] sm:$0xff] (!%p168_p9)  ;;  %v266_v1 = vld [vmem:[%s2818_s1 + $0x88] sm:$0xff] (!%p168_p9)  ;;  %s1205_s7 = sshll.u32 (!%p168_p9), %s2082_s19, 1  ;;  %v267_v5 = vld [vmem:[%s2818_s1 + $0x90] sm:$0xff] (!%p168_p9)  ;;  %v206_v37 = vlaneseq (!%p168_p9)  ;;  %vm2030_vm6 = vmmov (!%p168_p9), 0   ;;  %vm1024_vm7 = vcmask (!%p168_p9), 1041409  }
   0xe   : > { %171 = sbr.rel (%p168_p9) target bundleno = 1001 (0x3e9), region = 36  ;;  %v249_v2 = vld [vmem:[%s2818_s1] sm:$0xff] (!%p168_p9)  ;;  %v1704_v3 = vpack.c.bf16 (!%p168_p9), %v266_v1, %v265_v0  ;;  %v250_v4 = vld [vmem:[%s2818_s1 + $0x8] sm:$0xff] (!%p168_p9)  ;;  %v268_v6 = vld [vmem:[%s2818_s1 + $0x98] sm:$0xff] (!%p168_p9)  ;;  %p2128_p10 = scmp.lt.s32.totalorder (!%p168_p9), %s1205_s7, 3 }
   0xf   : > { %v1706_v7 = vpack.c.bf16 (!%p168_p9), %v250_v4, %v249_v2  ;;  %v1708_v8 = vpack.c.bf16 (!%p168_p9), %v268_v6, %v267_v5  ;;  %v281_v9 = vld [vmem:[%s2818_s1 + $0x100] sm:$0xff] (!%p168_p9)  ;;  %v282_v10 = vld [vmem:[%s2818_s1 + $0x108] sm:$0xff] (!%p168_p9)  ;;  %v251_v11 = vld [vmem:[%s2818_s1 + $0x10] sm:$0xff] (!%p168_p9)  ;;  %v2220_v48 = vshrl.u32 (!%p168_p9), %v206_v37, 7  ;;  %s191_s20 = sand.u32 (!%p168_p9), 1, %s2019_s16   ;;  %s1341_s28 = sshll.u32 (!%p168_p9), %s2082_s19, 5 }
  0x10   : > { %1705 = vmatprep.subr.bf16.mxu0 (!%p168_p9), %v1704_v3  ;;  %v1736_v12 = vpack.c.bf16 (!%p168_p9), %v282_v10, %v281_v9  ;;  %v252_v13 = vld [vmem:[%s2818_s1 + $0x18] sm:$0xff] (!%p168_p9)  ;;  %v269_v14 = vld [vmem:[%s2818_s1 + $0xa0] sm:$0xff] (!%p168_p9)  ;;  %v270_v15 = vld [vmem:[%s2818_s1 + $0xa8] sm:$0xff] (!%p168_p9)  ;;  %s1204_s22 = sshll.u32 (!%p168_p9), %s191_s20, 1  ;;  %s2774_s6 = scalar_lea.hbm (!%p168_p9), %s2821_s4, %s1341_s28 }
  0x11   : > { %1707 = vmatpush3.bf16.msra.mxu0 (!%p168_p9), %v1706_v7  ;;  %v1710_v16 = vpack.c.bf16 (!%p168_p9), %v252_v13, %v251_v11  ;;  %v283_v17 = vld [vmem:[%s2818_s1 + $0x110] sm:$0xff] (!%p168_p9)  ;;  %v284_v18 = vld [vmem:[%s2818_s1 + $0x118] sm:$0xff] (!%p168_p9)  ;;  %v1712_v19 = vpack.c.bf16 (!%p168_p9), %v270_v15, %v269_v14  ;;  %v253_v21 = vld [vmem:[%s2818_s1 + $0x20] sm:$0xff] (!%p168_p9)  ;;  %vm240_vm0 = vcmp.lt.s32.totalorder (!%p168_p9), %v2220_v48, 7  ;;  %v208_v14 = vadd.s32 (!%p168_p9), 8, %v2220_v48  ;;  %s193_s23 = scalar_lea.vmem (!%p168_p9), [#allocation2], %s1204_s22 }
  0x12   : > { %1709 = vmatprep.subr.bf16.mxu0 (!%p168_p9), %v1708_v8  ;;  %1737 = vmatprep.subr.bf16.mxu1 (!%p168_p9), %v1736_v12  ;;  %v1740_v20 = vpack.c.bf16 (!%p168_p9), %v284_v18, %v283_v17  ;;  %v254_v22 = vld [vmem:[%s2818_s1 + $0x28] sm:$0xff] (!%p168_p9)  ;;  %v271_v23 = vld [vmem:[%s2818_s1 + $0xb0] sm:$0xff] (!%p168_p9)  ;;  %v272_v24 = vld [vmem:[%s2818_s1 + $0xb8] sm:$0xff] (!%p168_p9)  ;;  %v211_v18 = vand.u32 (!%p168_p9), 15, %v2220_v48  ;;  %vm227_vm1 = vcmp.lt.s32.totalorder (!%p168_p9), %v2220_v48, 1  ;;  %s1138_s27 = sshll.u32 (!%p168_p9), %s193_s23, 4  ;;  %s2769_s27 = int_to_ptr.vmem [resolvable:$true] %s1138_s27 }
  0x13   : > { %1739 = vmatpush3.bf16.msra.mxu1 (!%p168_p9), %v1736_v12  ;;  %v285_v25 = vld [vmem:[%s2818_s1 + $0x120] sm:$0xff] (!%p168_p9)  ;;  %v286_v26 = vld [vmem:[%s2818_s1 + $0x128] sm:$0xff] (!%p168_p9)  ;;  %v1714_v28 = vpack.c.bf16 (!%p168_p9), %v254_v22, %v253_v21  ;;  %v287_v29 = vld [vmem:[%s2818_s1 + $0x130] sm:$0xff] (!%p168_p9)  ;;  %v1716_v31 = vpack.c.bf16 (!%p168_p9), %v272_v24, %v271_v23  ;;  %s1965_s8 = scalar_lea.vmem (!%p168_p9), %s2769_s27, 32  ;;  %s2033_s19 = smov (!%p168_p9), [#allocation2]  }
  0x14   : > { %1741 = vmatprep.subr.bf16.mxu1 (!%p168_p9), %v1740_v20  ;;  %v1744_v27 = vpack.c.bf16 (!%p168_p9), %v286_v26, %v285_v25  ;;  %v288_v30 = vld [vmem:[%s2818_s1 + $0x138] sm:$0xff] (!%p168_p9)  ;;  %v255_v32 = vld [vmem:[%s2818_s1 + $0x30] sm:$0xff] (!%p168_p9)  ;;  %v273_v34 = vld [vmem:[%s2818_s1 + $0xc0] sm:$0xff] (!%p168_p9)  ;;  %vm2320_vm2 = vcmp.ne.s32.totalorder (!%p168_p9), %v211_v18, 0  ;;  %p1966_p11 = scmp.ne.s32.totalorder (!%p168_p9), %s2769_s27, %s1965_s8  ;;  %s1969_s9 = sshll.u32 (!%p168_p9), %s2033_s19, 4  ;;  %s1970_s9 = int_to_ptr.vmem [resolvable:$false] %s1969_s9 }
  0x15   : > { %s2838_s7 = smov (!%p2128_p10, %s1205_s7), 3  ;;  %1711 = vmatpush3.bf16.msra.mxu0 %v1710_v16  ;;  %v256_v33 = vld [vmem:[%s2818_s1 + $0x38] sm:$0xff]  ;;  %v274_v35 = vld [vmem:[%s2818_s1 + $0xc8] sm:$0xff]  ;;  %v1748_v36 = vpack.c.bf16 %v288_v30, %v287_v29  ;;  %v289_v39 = vld [vmem:[%s2818_s1 + $0x140] sm:$0xff]  ;;  %v210_v30 = vadd.s32 24, %v2220_v48  ;;  %s1971_s10 = scalar_lea.vmem %s1970_s9, 64 }
  0x16   : > { %1713 = vmatprep.subr.bf16.mxu0 %v1712_v19  ;;  %s1340_s29 = sshll.u32 %s2838_s7, 4  ;;  %v1718_v38 = vpack.c.bf16 %v256_v33, %v255_v32  ;;  %v290_v40 = vld [vmem:[%s2818_s1 + $0x148] sm:$0xff]  ;;  %v1720_v41 = vpack.c.bf16 %v274_v35, %v273_v34  ;;  %v257_v42 = vld [vmem:[%s2818_s1 + $0x40] sm:$0xff]  ;;  %v275_v44 = vld [vmem:[%s2818_s1 + $0xd0] sm:$0xff]  ;;  %p1967_p12 = pnand %p1966_p11, %p2099_p5 }
  0x17   : > { %1743 = vmatpush3.bf16.msra.mxu1 %v1740_v20  ;;  %s2203_s13 = scalar_lea.vmem %s2817_s0, %s1340_s29  ;;  %v258_v43 = vld [vmem:[%s2818_s1 + $0x48] sm:$0xff]  ;;  %v276_v45 = vld [vmem:[%s2818_s1 + $0xd8] sm:$0xff]  ;;  %v1752_v46 = vpack.c.bf16 %v290_v40, %v289_v39  ;;  %v291_v50 = vld [vmem:[%s2818_s1 + $0x150] sm:$0xff]  ;;  %s2776_s29 = scalar_lea.sflag [#allocation3], %s191_s20 }
  0x18   : > { %1745 = vmatprep.subr.bf16.mxu1 %v1744_v27  ;;  %v2218_v47 = vld [vmem:[%s2203_s13] sm:$0xff]  ;;  %v1722_v49 = vpack.c.bf16 %v258_v43, %v257_v42  ;;  %v292_v51 = vld [vmem:[%s2818_s1 + $0x158] sm:$0xff]  ;;  %v1724_v53 = vpack.c.bf16 %v276_v45, %v275_v44  ;;  %v259_v54 = vld [vmem:[%s2818_s1 + $0x50] sm:$0xff]  ;;  %p1968_p13 = pneg %p1967_p12  ;;  %p1972_p0 = scmp.lt.s32.totalorder %s2769_s27, %s1970_s9 }
  0x19   : > { %1715 = vmatpush3.bf16.msra.mxu0 %v1714_v28  ;;  %v236_v52 = vrot.slane %v2218_v47, 1  ;;  %368 = vmatprep.mubr.f32.mxu0 %v2218_v47  ;;  %v260_v55 = vld [vmem:[%s2818_s1 + $0x58] sm:$0xff]  ;;  %v2237_v56 = vld [vmem:[%s2203_s13 + $0x8] sm:$0xff]  ;;  %v277_v57 = vld [vmem:[%s2818_s1 + $0xe0] sm:$0xff]  ;;  %v1756_v60 = vpack.c.bf16 %v292_v51, %v291_v50  ;;  %v223_v21 = vrot.slane %v2218_v47, 7  ;;  %v212_v28 = vand.u32 15, %v208_v14  ;;  %p1973_p1 = scmp.lt.s32.totalorder %s1971_s10, %s1965_s8 }
  0x1a   : > { %1717 = vmatprep.subr.bf16.mxu0 %v1716_v31  ;;  %v278_v58 = vld [vmem:[%s2818_s1 + $0xe8] sm:$0xff]  ;;  %v237_v59 = vrot.slane %v2237_v56, 1  ;;  %v1726_v61 = vpack.c.bf16 %v260_v55, %v259_v54  ;;  %v293_v62 = vld [vmem:[%s2818_s1 + $0x160] sm:$0xff]  ;;  %v279_v4 = vld [vmem:[%s2818_s1 + $0xf0] sm:$0xff]  ;;  %v224_v37 = vrot.slane %v2237_v56, 7 }
  0x1b   : > { %1747 = vmatpush3.bf16.msra.mxu1 %v1744_v27  ;;  %v294_v63 = vld [vmem:[%s2818_s1 + $0x168] sm:$0xff]  ;;  %v1728_v1 = vpack.c.bf16 %v278_v58, %v277_v57  ;;  %v261_v2 = vld [vmem:[%s2818_s1 + $0x60] sm:$0xff]  ;;  %v280_v5 = vld [vmem:[%s2818_s1 + $0xf8] sm:$0xff]  ;;  %vm2347_vm3 = vcmp.ne.s32.totalorder %v212_v28, 15  ;;  %p1974_p2 = por %p1973_p1, %p1972_p0 }
  0x1c   : > { %1749 = vmatprep.subr.bf16.mxu1 %v1748_v36  ;;  %v243_v0 = vsel %vm240_vm0, %v236_v52, %v237_v59  ;;  %v262_v3 = vld [vmem:[%s2818_s1 + $0x68] sm:$0xff]  ;;  %v1760_v6 = vpack.c.bf16 %v294_v63, %v293_v62  ;;  %v295_v8 = vld [vmem:[%s2818_s1 + $0x170] sm:$0xff]  ;;  %v296_v9 = vld [vmem:[%s2818_s1 + $0x178] sm:$0xff]  ;;  %v1732_v10 = vpack.c.bf16 %v280_v5, %v279_v4 }
  0x1d   : > { %1719 = vmatpush3.bf16.msra.mxu0 %v1718_v38  ;;  %1587 = vmatprep.mubr.f32.mxu1 %v243_v0  ;;  %v1730_v7 = vpack.c.bf16 %v262_v3, %v261_v2  ;;  %v263_v11 = vld [vmem:[%s2818_s1 + $0x70] sm:$0xff]  ;;  %v264_v12 = vld [vmem:[%s2818_s1 + $0x78] sm:$0xff]  ;;  %v1233_v15 = vld [vmem:[%s2818_s1 + $0x200] sm:$0xff]  ;;  %v1764_v19 = vpack.c.bf16 %v296_v9, %v295_v8  ;;  %v209_v38 = vadd.s32 16, %v2220_v48  ;;  %p1975_p3 = pnand %p1974_p2, %p1968_p13 }
  0x1e   : > { %1721 = vmatprep.subr.bf16.mxu0 %v1720_v41  ;;  %v2284_v13 = vld [vmem:[%s2203_s13 + $0x18] sm:$0xff]  ;;  %v1234_v16 = vld [vmem:[%s2818_s1 + $0x208] sm:$0xff]  ;;  %v2294_v17 = vld [vmem:[%s2203_s13 + $0x10] sm:$0xff]  ;;  %v1734_v20 = vpack.c.bf16 %v264_v12, %v263_v11 }
  0x1f   : > { %1751 = vmatpush3.bf16.msra.mxu1 %v1748_v36  ;;  %v226_v22 = vrot.slane %v2284_v13, 7  ;;  %v1249_v23 = vld [vmem:[%s2818_s1 + $0x280] sm:$0xff]  ;;  %v1250_v24 = vld [vmem:[%s2818_s1 + $0x288] sm:$0xff]  ;;  %v1768_v25 = vpack.c.bf16 %v1234_v16, %v1233_v15  ;;  %v238_v29 = vrot.slane %v2294_v17, 1  ;;  %v1235_v31 = vld [vmem:[%s2818_s1 + $0x210] sm:$0xff]  ;;  %v239_v34 = vrot.slane %v2284_v13, 1 }
  0x20   : > { %1753 = vmatprep.subr.bf16.mxu1 %v1752_v46  ;;  %v1217_v26 = vld [vmem:[%s2818_s1 + $0x180] sm:$0xff]  ;;  %v1218_v27 = vld [vmem:[%s2818_s1 + $0x188] sm:$0xff]  ;;  %v1236_v32 = vld [vmem:[%s2818_s1 + $0x218] sm:$0xff]  ;;  %v1800_v35 = vpack.c.bf16 %v1250_v24, %v1249_v23  ;;  %v213_v54 = vand.u32 15, %v209_v38  ;;  %v225_v55 = vrot.slane %v2294_v17, 7 }
  0x21   : > { %1723 = vmatpush3.bf16.msra.mxu0 %v1722_v49  ;;  %v231_v36 = vsel %vm227_vm1, %v226_v22, %v223_v21  ;;  %v1251_v39 = vld [vmem:[%s2818_s1 + $0x290] sm:$0xff]  ;;  %v1252_v40 = vld [vmem:[%s2818_s1 + $0x298] sm:$0xff]  ;;  %v1770_v41 = vpack.c.bf16 %v1218_v27, %v1217_v26  ;;  %v1772_v42 = vpack.c.bf16 %v1236_v32, %v1235_v31  ;;  %v242_v45 = vsel %vm240_vm0, %v237_v59, %v238_v29  ;;  %v1253_v57 = vld [vmem:[%s2818_s1 + $0x2a0] sm:$0xff] }
  0x22   : > { %1725 = vmatprep.subr.bf16.mxu0 %v1724_v53  ;;  %v1219_v43 = vld [vmem:[%s2818_s1 + $0x190] sm:$0xff]  ;;  %v1220_v44 = vld [vmem:[%s2818_s1 + $0x198] sm:$0xff]  ;;  %v214_v49 = vand.u32 15, %v210_v30  ;;  %v241_v50 = vsel %vm240_vm0, %v238_v29, %v239_v34  ;;  %v1804_v51 = vpack.c.bf16 %v1252_v40, %v1251_v39  ;;  %v230_v53 = vsel %vm227_vm1, %v223_v21, %v224_v37  ;;  %v1254_v58 = vld [vmem:[%s2818_s1 + $0x2a8] sm:$0xff] }
  0x23   : > { %1755 = vmatpush3.bf16.msra.mxu1 %v1752_v46  ;;  %v1774_v59 = vpack.c.bf16 %v1220_v44, %v1219_v43  ;;  %v229_v62 = vsel %vm227_vm1, %v224_v37, %v225_v55  ;;  %vm2378_vm5 = vcmp.ne.s32.totalorder %v213_v54, 0  ;;  %v228_v47 = vsel %vm227_vm1, %v225_v55, %v226_v22  ;;  %v1238_v0 = vld [vmem:[%s2818_s1 + $0x228] sm:$0xff]  ;;  %v1256_v3 = vld [vmem:[%s2818_s1 + $0x2b8] sm:$0xff]  ;;  %v1221_v4 = vld [vmem:[%s2818_s1 + $0x1a0] sm:$0xff] }
  0x24   : > { %1757 = vmatprep.subr.bf16.mxu1 %v1756_v60  ;;  %vm2371_vm4 = vcmp.ne.s32.totalorder %v214_v49, 15  ;;  %v1222_v5 = vld [vmem:[%s2818_s1 + $0x1a8] sm:$0xff]  ;;  %v1239_v8 = vld [vmem:[%s2818_s1 + $0x230] sm:$0xff]  ;;  %v1240_v9 = vld [vmem:[%s2818_s1 + $0x238] sm:$0xff] }
  0x25   : > { %1727 = vmatpush3.bf16.msra.mxu0 %v1726_v61  ;;  %v1808_v61 = vpack.c.bf16 %v1254_v58, %v1253_v57  ;;  %v1780_v11 = vpack.c.bf16 %v1240_v9, %v1239_v8  ;;  %v1258_v12 = vld [vmem:[%s2818_s1 + $0x2c8] sm:$0xff]  ;;  %v1224_v15 = vld [vmem:[%s2818_s1 + $0x1b8] sm:$0xff]  ;;  %v1225_v22 = vld [vmem:[%s2818_s1 + $0x1c0] sm:$0xff] }
  0x26   : > { %1729 = vmatprep.subr.bf16.mxu0 %v1728_v1  ;;  %v1255_v1 = vld [vmem:[%s2818_s1 + $0x2b0] sm:$0xff]  ;;  %v1242_v18 = vld [vmem:[%s2818_s1 + $0x248] sm:$0xff]  ;;  %v1260_v21 = vld [vmem:[%s2818_s1 + $0x2d8] sm:$0xff] }
  0x27   : > { %1759 = vmatpush3.bf16.msra.mxu1 %v1756_v60  ;;  %v1226_v23 = vld [vmem:[%s2818_s1 + $0x1c8] sm:$0xff]  ;;  %v1243_v26 = vld [vmem:[%s2818_s1 + $0x250] sm:$0xff]  ;;  %v1244_v27 = vld [vmem:[%s2818_s1 + $0x258] sm:$0xff] }
  0x28   : > { %1761 = vmatprep.subr.bf16.mxu1 %v1760_v6  ;;  %v1261_v28 = vld [vmem:[%s2818_s1 + $0x2e0] sm:$0xff]  ;;  %v1788_v29 = vpack.c.bf16 %v1244_v27, %v1243_v26  ;;  %v1262_v30 = vld [vmem:[%s2818_s1 + $0x2e8] sm:$0xff]  ;;  %v1227_v31 = vld [vmem:[%s2818_s1 + $0x1d0] sm:$0xff] }
  0x29   : > { %1731 = vmatpush3.bf16.msra.mxu0 %v1730_v7  ;;  %v1778_v7 = vpack.c.bf16 %v1222_v5, %v1221_v4  ;;  %v1228_v32 = vld [vmem:[%s2818_s1 + $0x1d8] sm:$0xff]  ;;  %v1246_v37 = vld [vmem:[%s2818_s1 + $0x268] sm:$0xff]  ;;  %v1263_v38 = vld [vmem:[%s2818_s1 + $0x2f0] sm:$0xff] }
  0x2a   : > { %1733 = vmatprep.subr.bf16.mxu0 %v1732_v10  ;;  %v1257_v10 = vld [vmem:[%s2818_s1 + $0x2c0] sm:$0xff]  ;;  %v1264_v40 = vld [vmem:[%s2818_s1 + $0x2f8] sm:$0xff]  ;;  %v1308_v57 = vld [vmem:[%s2818_s1 + $0x408] sm:$0xff] }
  0x2b   : > { %1763 = vmatpush3.bf16.msra.mxu1 %v1760_v6  ;;  %v1812_v6 = vpack.c.bf16 %v1256_v3, %v1255_v1  ;;  %v1816_v14 = vpack.c.bf16 %v1258_v12, %v1257_v10  ;;  %v1828_v43 = vpack.c.bf16 %v1264_v40, %v1263_v38  ;;  %v1248_v49 = vld [vmem:[%s2818_s1 + $0x278] sm:$0xff]  ;;  %v1307_v55 = vld [vmem:[%s2818_s1 + $0x400] sm:$0xff]  ;;  %v1309_v27 = vld [vmem:[%s2818_s1 + $0x410] sm:$0xff] }
  0x2c   : > { %1765 = vmatprep.subr.bf16.mxu1 %v1764_v19  ;;  %v1291_v58 = vld [vmem:[%s2818_s1 + $0x380] sm:$0xff]  ;;  %v1007_v33 = vld [vmem:[%s2820_s3 + $0x8] sm:$0xff]  ;;  %v1008_v60 = vld [vmem:[%s2820_s3 + $0x10] sm:$0xff] }
  0x2d   : > { %1735 = vmatpush3.bf16.msra.mxu0 %v1734_v20  ;;  %v1006_v46 = vld [vmem:[%s2820_s3] sm:$0xff]  ;;  %v1009_v63 = vld [vmem:[%s2820_s3 + $0x18] sm:$0xff] }
  0x2e   : > { %1769 = vmatprep.subr.bf16.mxu0 %v1768_v25  ;;  %v1786_v25 = vpack.c.bf16 %v1226_v23, %v1225_v22 }
  0x2f   : > { %1767 = vmatpush3.bf16.msra.mxu1 %v1764_v19  ;;  %v1259_v19 = vld [vmem:[%s2818_s1 + $0x2d0] sm:$0xff] }
  0x30   : > { %1210 = vmatmul.mubr.msk.f32.vlgmr.msra.gmra.mrb[0].mxu0 %vm2320_vm2, %v231_v36  ;;  %1801 = vmatprep.subr.bf16.mxu1 %v1800_v35  ;;  %v1820_v24 = vpack.c.bf16 %v1260_v21, %v1259_v19  ;;  %v1245_v36 = vld [vmem:[%s2818_s1 + $0x260] sm:$0xff] }
  0x31   : > { %373 = vmatprep.mubr.f32.mxu0 %v2237_v56  ;;  %1771 = vmatpush3.bf16.msra.mxu0 %v1770_v41  ;;  %v244_v56 = vsel %vm240_vm0, %v239_v34, %v236_v52  ;;  %v1237_v52 = vld [vmem:[%s2818_s1 + $0x220] sm:$0xff]  ;;  %v1824_v34 = vpack.c.bf16 %v1262_v30, %v1261_v28  ;;  %v1792_v39 = vpack.c.bf16 %v1246_v37, %v1245_v36  ;;  %v1310_v28 = vld [vmem:[%s2818_s1 + $0x418] sm:$0xff]  ;;  %v1276_v36 = vld [vmem:[%s2818_s1 + $0x308] sm:$0xff] }
  0x32   : > { %1588 = vmatmul.mubr.msk.f32.vlgmr.msra.gmra.mrb[0].mxu1 %vm2347_vm3, %v242_v45  ;;  %1773 = vmatprep.subr.bf16.mxu0 %v1772_v42  ;;  %v1776_v2 = vpack.c.bf16 %v1238_v0, %v1237_v52  ;;  %v1229_v41 = vld [vmem:[%s2818_s1 + $0x1e0] sm:$0xff]  ;;  %v1230_v42 = vld [vmem:[%s2818_s1 + $0x1e8] sm:$0xff]  ;;  %v1247_v45 = vld [vmem:[%s2818_s1 + $0x270] sm:$0xff] }
  0x33   : > { %1590 = vmatprep.mubr.f32.mxu1 %v241_v50  ;;  %1803 = vmatpush3.bf16.msra.mxu1 %v1800_v35  ;;  %v1790_v35 = vpack.c.bf16 %v1228_v32, %v1227_v31  ;;  %v1794_v44 = vpack.c.bf16 %v1230_v42, %v1229_v41  ;;  %v1796_v50 = vpack.c.bf16 %v1248_v49, %v1247_v45  ;;  %v1208_v52 = vld [vmem:[%s2819_s2] ss:$0 sm:$0xff] }
  0x34   : > { %374 = vmatmul.mubr.f32.gmra.mrb[2].mxu0 %v230_v53  ;;  %1805 = vmatprep.subr.bf16.mxu1 %v1804_v51  ;;  %v1232_v53 = vld [vmem:[%s2818_s1 + $0x1f8] sm:$0xff]  ;;  %v1868_v31 = vpack.c.bf16 %v1310_v28, %v1309_v27  ;;  %v1301_v28 = vld [vmem:[%s2818_s1 + $0x3d0] sm:$0xff] }
  0x35   : > { %378 = vmatprep.mubr.f32.mxu0 %v2294_v17  ;;  %1775 = vmatpush3.bf16.msra.mxu0 %v1774_v59  ;;  %v1241_v17 = vld [vmem:[%s2818_s1 + $0x240] sm:$0xff]  ;;  %v1864_v59 = vpack.c.bf16 %v1308_v57, %v1307_v55 }
  0x36   : > { %1591 = vmatmul.mubr.msk.f32.gmra.mrb[2].mxu1 %vm2371_vm4, %v244_v56  ;;  %1777 = vmatprep.subr.bf16.mxu0 %v1776_v2  ;;  %v1784_v20 = vpack.c.bf16 %v1242_v18, %v1241_v17  ;;  %v1292_v56 = vld [vmem:[%s2818_s1 + $0x388] sm:$0xff]  ;;  %v1311_v55 = vld [vmem:[%s2818_s1 + $0x420] sm:$0xff] }
  0x37   : > { %1807 = vmatpush3.bf16.msra.mxu1 %v1804_v51  ;;  %v1231_v51 = vld [vmem:[%s2818_s1 + $0x1f0] sm:$0xff] }
  0x38   : > { %1212 = vmatmul.mubr.msk.f32.gmra.mrb[4].mxu0 %vm2378_vm5, %v229_v62  ;;  %1809 = vmatprep.subr.bf16.mxu1 %v1808_v61  ;;  %v1798_v54 = vpack.c.bf16 %v1232_v53, %v1231_v51  ;;  %v1293_v53 = vld [vmem:[%s2818_s1 + $0x390] sm:$0xff] }
  0x39   : > { %383 = vmatprep.mubr.f32.mxu0 %v2284_v13  ;;  %1779 = vmatpush3.bf16.msra.mxu0 %v1778_v7  ;;  %v1223_v13 = vld [vmem:[%s2818_s1 + $0x1b0] sm:$0xff] }
  0x3a   : > { %1781 = vmatprep.subr.bf16.mxu0 %v1780_v11  ;;  %v1782_v16 = vpack.c.bf16 %v1224_v15, %v1223_v13 }
  0x3b   : > { %1811 = vmatpush3.bf16.msra.mxu1 %v1808_v61  ;;  %v1832_v61 = vpack.c.bf16 %v1292_v56, %v1291_v58  ;;  %v1312_v58 = vld [vmem:[%s2818_s1 + $0x428] sm:$0xff]  ;;  %v1278_v56 = vld [vmem:[%s2818_s1 + $0x318] sm:$0xff] }
  0x3c   : > { %384 = vmatmul.mubr.f32.gmra.mrb[6].mxu0 %v228_v47  ;;  %1813 = vmatprep.subr.bf16.mxu1 %v1812_v6 }
  0x3d   : > { %1783 = vmatpush3.bf16.msra.mxu0 %v1782_v16 }
  0x3e   : > { %1785 = vmatprep.subr.bf16.mxu0 %v1784_v20 }
  0x3f   : > { %1815 = vmatpush3.bf16.msra.mxu1 %v1812_v6 }
  0x40   : > { %1817 = vmatprep.subr.bf16.mxu1 %v1816_v14 }
  0x41   : > { %1787 = vmatpush3.bf16.msra.mxu0 %v1786_v25 }
  0x42   : > { %1789 = vmatprep.subr.bf16.mxu0 %v1788_v29 }
  0x43   : > { %1819 = vmatpush3.bf16.msra.mxu1 %v1816_v14 }
  0x44   : > { %1821 = vmatprep.subr.bf16.mxu1 %v1820_v24 }
  0x45   : > { %1791 = vmatpush3.bf16.msra.mxu0 %v1790_v35  ;;  %v1275_v35 = vld [vmem:[%s2818_s1 + $0x300] sm:$0xff] }
  0x46   : > { %1793 = vmatprep.subr.bf16.mxu0 %v1792_v39  ;;  %v1834_v40 = vpack.c.bf16 %v1276_v36, %v1275_v35  ;;  %v1285_v35 = vld [vmem:[%s2818_s1 + $0x350] sm:$0xff]  ;;  %v1286_v36 = vld [vmem:[%s2818_s1 + $0x358] sm:$0xff] }
  0x47   : > { %1823 = vmatpush3.bf16.msra.mxu1 %v1820_v24 }
  0x48   : > { %1825 = vmatprep.subr.bf16.mxu1 %v1824_v34 }
  0x49   : > { %1795 = vmatpush3.bf16.msra.mxu0 %v1794_v44 }
  0x4a   : > { %1797 = vmatprep.subr.bf16.mxu0 %v1796_v50 }
  0x4b   : > { %1827 = vmatpush3.bf16.msra.mxu1 %v1824_v34 }
  0x4c   : > { %1829 = vmatprep.subr.bf16.mxu1 %v1828_v43 }
  0x4d   : > { %1799 = vmatpush3.bf16.msra.mxu0 %v1798_v54  ;;  %v1294_v54 = vld [vmem:[%s2818_s1 + $0x398] sm:$0xff] }
  0x4e   : > { %1833 = vmatprep.subr.bf16.mxu0 %v1832_v61  ;;  %v1836_v57 = vpack.c.bf16 %v1294_v54, %v1293_v53  ;;  %v1872_v61 = vpack.c.bf16 %v1312_v58, %v1311_v55  ;;  %v1306_v53 = vld [vmem:[%s2818_s1 + $0x3f8] sm:$0xff]  ;;  %v1289_v55 = vld [vmem:[%s2818_s1 + $0x370] sm:$0xff] }
  0x4f   : > { %1831 = vmatpush3.bf16.msra.mxu1 %v1828_v43 }
  0x50   : > { %1865 = vmatprep.subr.bf16.mxu1 %v1864_v59 }
 0x103   : > { %v1378_v62 = vpop.f32.mrb[0].mxu0 }
 0x104   : > { %v1379_v47 = vpop.f32.mrb[1].mxu0 }
 0x105   : > { %v1380_v0 = vadd.f32 %v1379_v47, %v1378_v62  ;;  %v1589_v1 = vpop.f32.mrb[0].mxu1  ;;  %v1295_v47 = vld [vmem:[%s2818_s1 + $0x3a0] sm:$0xff] }
 0x106   : > { %v455_v2 = vpop.f32.mrb[1].mxu1 }
 0x107   : > { %v1381_v3 = vpop.f32.mrb[2].mxu0  ;;  %v371_v4 = vadd.f32 %v1380_v0, %v1208_v52  ;;  %v1313_v0 = vld [vmem:[%s2818_s1 + $0x430] sm:$0xff] }
 0x108   : > { %v1382_v5 = vpop.f32.mrb[3].mxu0 }
 0x109   : > { %v1383_v6 = vadd.f32 %v1382_v5, %v1381_v3  ;;  %v456_v7 = vadd.f32 %v455_v2, %v371_v4  ;;  %v1592_v8 = vpop.f32.mrb[2].mxu1  ;;  %v1314_v2 = vld [vmem:[%s2818_s1 + $0x438] sm:$0xff]  ;;  %v1279_v3 = vld [vmem:[%s2818_s1 + $0x320] sm:$0xff]  ;;  %v1280_v4 = vld [vmem:[%s2818_s1 + $0x328] sm:$0xff] }
 0x10a   : > { %v465_v9 = vpop.f32.mrb[3].mxu1  ;;  %v1876_v5 = vpack.c.bf16 %v1314_v2, %v1313_v0 }
 0x10b   : > { %v376_v10 = vadd.f32 %v1383_v6, %v1208_v52  ;;  %v2508_v11 = vmax.f32 %v456_v7, 0.0  ;;  %v1384_v12 = vpop.f32.mrb[4].mxu0  ;;  %v1842_v6 = vpack.c.bf16 %v1280_v4, %v1279_v3  ;;  %v1297_v7 = vld [vmem:[%s2818_s1 + $0x3b0] sm:$0xff] }
 0x10c   : > { %v1385_v13 = vpop.f32.mrb[5].mxu0 }
 0x10d   : > { %v461_v14 = vadd.f32 %v1589_v1, %v376_v10  ;;  %v1386_v15 = vadd.f32 %v1385_v13, %v1384_v12  ;;  %623 = vmatprep.mubr.f32.mxu0 %v2508_v11  ;;  %v490_v22 = vrot.slane %v2508_v11, 1  ;;  %v478_v37 = vrot.slane %v2508_v11, 7  ;;  %v1316_v12 = vld [vmem:[%s2818_s1 + $0x448] sm:$0xff]  ;;  %v1281_v13 = vld [vmem:[%s2818_s1 + $0x330] sm:$0xff] }
 0x10f   : > { %v2511_v16 = vmax.f32 %v461_v14, 0.0  ;;  %v1387_v17 = vpop.f32.mrb[6].mxu0  ;;  %v381_v18 = vadd.f32 %v1386_v15, %v1208_v52  ;;  %v1282_v14 = vld [vmem:[%s2818_s1 + $0x338] sm:$0xff] }
 0x110   : > { %v1388_v19 = vpop.f32.mrb[7].mxu0 }
 0x111   : > { %v1389_v20 = vadd.f32 %v1388_v19, %v1387_v17  ;;  %v466_v21 = vadd.f32 %v465_v9, %v381_v18  ;;  %v491_v23 = vrot.slane %v2511_v16, 1  ;;  %v479_v44 = vrot.slane %v2511_v16, 7  ;;  %v1315_v9 = vld [vmem:[%s2818_s1 + $0x440] sm:$0xff]  ;;  %v1300_v19 = vld [vmem:[%s2818_s1 + $0x3c8] sm:$0xff] }
 0x112   : > { %v1880_v15 = vpack.c.bf16 %v1316_v12, %v1315_v9  ;;  %v1846_v17 = vpack.c.bf16 %v1282_v14, %v1281_v13  ;;  %v1299_v18 = vld [vmem:[%s2818_s1 + $0x3c0] sm:$0xff] }
 0x113   : > { %v386_v24 = vadd.f32 %v1389_v20, %v1208_v52  ;;  %v2515_v25 = vmax.f32 %v466_v21, 0.0  ;;  %v496_v26 = vsel %vm240_vm0, %v490_v22, %v491_v23  ;;  %v484_v45 = vsel %vm227_vm1, %v478_v37, %v479_v44  ;;  %v1296_v52 = vld [vmem:[%s2818_s1 + $0x3a8] sm:$0xff]  ;;  %v1317_v20 = vld [vmem:[%s2818_s1 + $0x450] sm:$0xff] }
 0x114   : > { %1625 = vmatprep.mubr.f32.mxu1 %v496_v26  ;;  %v1840_v1 = vpack.c.bf16 %v1296_v52, %v1295_v47  ;;  %v1848_v21 = vpack.c.bf16 %v1300_v19, %v1299_v18 }
 0x115   : > { %v471_v29 = vadd.f32 %v1592_v8, %v386_v24  ;;  %v492_v30 = vrot.slane %v2515_v25, 1  ;;  %v480_v49 = vrot.slane %v2515_v25, 7  ;;  %v1298_v8 = vld [vmem:[%s2818_s1 + $0x3b8] sm:$0xff]  ;;  %v1284_v24 = vld [vmem:[%s2818_s1 + $0x348] sm:$0xff] }
 0x116   : > { %v1844_v10 = vpack.c.bf16 %v1298_v8, %v1297_v7 }
 0x117   : > { %v2526_v32 = vmax.f32 %v471_v29, 0.0  ;;  %v495_v34 = vsel %vm240_vm0, %v491_v23, %v492_v30  ;;  %v483_v50 = vsel %vm227_vm1, %v479_v44, %v480_v49  ;;  %v1283_v23 = vld [vmem:[%s2818_s1 + $0x340] sm:$0xff]  ;;  %v1302_v29 = vld [vmem:[%s2818_s1 + $0x3d8] sm:$0xff] }
 0x118   : > { %1626 = vmatmul.mubr.msk.f32.vlgmr.msra.gmra.mrb[4].mxu1 %vm2347_vm3, %v495_v34  ;;  %v1850_v27 = vpack.c.bf16 %v1284_v24, %v1283_v23  ;;  %v1320_v34 = vld [vmem:[%s2818_s1 + $0x468] sm:$0xff]  ;;  %v1287_v44 = vld [vmem:[%s2818_s1 + $0x360] sm:$0xff] }
 0x119   : > { %v481_v38 = vrot.slane %v2526_v32, 7  ;;  %v493_v39 = vrot.slane %v2526_v32, 1  ;;  %1867 = vmatpush3.bf16.msra.mxu1 %v1864_v59  ;;  %v1277_v59 = vld [vmem:[%s2818_s1 + $0x310] sm:$0xff] }
 0x11a   : > { %1869 = vmatprep.subr.bf16.mxu1 %v1868_v31  ;;  %v1838_v62 = vpack.c.bf16 %v1278_v56, %v1277_v59 }
 0x11b   : > { %v485_v41 = vsel %vm227_vm1, %v481_v38, %v478_v37  ;;  %v494_v42 = vsel %vm240_vm0, %v492_v30, %v493_v39  ;;  %v497_v43 = vsel %vm240_vm0, %v493_v39, %v490_v22  ;;  %v482_v51 = vsel %vm227_vm1, %v480_v49, %v481_v38  ;;  %v1318_v22 = vld [vmem:[%s2818_s1 + $0x458] sm:$0xff]  ;;  %v1319_v30 = vld [vmem:[%s2818_s1 + $0x460] sm:$0xff] }
 0x11c   : > { %1268 = vmatmul.mubr.msk.f32.vlgmr.msra.gmra.mrb[8].mxu0 %vm2320_vm2, %v485_v41  ;;  %1628 = vmatprep.mubr.f32.mxu1 %v494_v42  ;;  %v1884_v26 = vpack.c.bf16 %v1318_v22, %v1317_v20  ;;  %v1888_v37 = vpack.c.bf16 %v1320_v34, %v1319_v30  ;;  %v1854_v38 = vpack.c.bf16 %v1286_v36, %v1285_v35  ;;  %v1303_v39 = vld [vmem:[%s2818_s1 + $0x3e0] sm:$0xff]  ;;  %v1321_v41 = vld [vmem:[%s2818_s1 + $0x470] sm:$0xff] }
 0x11d   : > { %628 = vmatprep.mubr.f32.mxu0 %v2511_v16  ;;  %1629 = vmatmul.mubr.msk.f32.gmra.mrb[6].mxu1 %vm2371_vm4, %v497_v43  ;;  %v1322_v43 = vld [vmem:[%s2818_s1 + $0x478] sm:$0xff] }
 0x11e   : > { %1835 = vmatpush3.bf16.msra.mxu0 %v1834_v40  ;;  %1871 = vmatpush3.bf16.msra.mxu1 %v1868_v31  ;;  %v1852_v31 = vpack.c.bf16 %v1302_v29, %v1301_v28  ;;  %v1304_v40 = vld [vmem:[%s2818_s1 + $0x3e8] sm:$0xff]  ;;  %v1892_v49 = vpack.c.bf16 %v1322_v43, %v1321_v41 }
 0x11f   : > { %1837 = vmatprep.subr.bf16.mxu0 %v1836_v57  ;;  %1873 = vmatprep.subr.bf16.mxu1 %v1872_v61  ;;  %v1856_v42 = vpack.c.bf16 %v1304_v40, %v1303_v39  ;;  %v1290_v57 = vld [vmem:[%s2818_s1 + $0x378] sm:$0xff] }
 0x120   : > { %629 = vmatmul.mubr.f32.gmra.mrb[10].mxu0 %v484_v45  ;;  %v1288_v45 = vld [vmem:[%s2818_s1 + $0x368] sm:$0xff]  ;;  %v1862_v58 = vpack.c.bf16 %v1290_v57, %v1289_v55  ;;  %v1013_v55 = vld [vmem:[%s2820_s3 + $0x38] sm:$0xff] }
 0x121   : > { %633 = vmatprep.mubr.f32.mxu0 %v2515_v25 }
 0x122   : > { %1839 = vmatpush3.bf16.msra.mxu0 %v1838_v62  ;;  %1875 = vmatpush3.bf16.msra.mxu1 %v1872_v61  ;;  %v1266_v62 = vld [vmem:[%s2819_s2 + $0x1] ss:$0 sm:$0xff] }
 0x123   : > { %1841 = vmatprep.subr.bf16.mxu0 %v1840_v1  ;;  %1877 = vmatprep.subr.bf16.mxu1 %v1876_v5 }
 0x124   : > { %1270 = vmatmul.mubr.msk.f32.gmra.mrb[12].mxu0 %vm2378_vm5, %v483_v50  ;;  %v1858_v50 = vpack.c.bf16 %v1288_v45, %v1287_v44  ;;  %v1897_v44 = vpack.c.bf16 %v1007_v33, %v1006_v46  ;;  %v2029_v45 = vmov 0.0|0.0  }
 0x125   : > { %638 = vmatprep.mubr.f32.mxu0 %v2526_v32 }
 0x126   : > { %1843 = vmatpush3.bf16.msra.mxu0 %v1842_v6  ;;  %1879 = vmatpush3.bf16.msra.mxu1 %v1876_v5 }
 0x127   : > { %1845 = vmatprep.subr.bf16.mxu0 %v1844_v10  ;;  %1881 = vmatprep.subr.bf16.mxu1 %v1880_v15 }
 0x128   : > { %639 = vmatmul.mubr.f32.gmra.mrb[14].mxu0 %v482_v51  ;;  %v1305_v51 = vld [vmem:[%s2818_s1 + $0x3f0] sm:$0xff] }
 0x129   : > { %v1860_v54 = vpack.c.bf16 %v1306_v53, %v1305_v51  ;;  %v1011_v51 = vld [vmem:[%s2820_s3 + $0x28] sm:$0xff] }
 0x12a   : > { %1847 = vmatpush3.bf16.msra.mxu0 %v1846_v17  ;;  %1883 = vmatpush3.bf16.msra.mxu1 %v1880_v15 }
 0x12b   : > { %1849 = vmatprep.subr.bf16.mxu0 %v1848_v21  ;;  %1885 = vmatprep.subr.bf16.mxu1 %v1884_v26 }
 0x12e   : > { %1851 = vmatpush3.bf16.msra.mxu0 %v1850_v27  ;;  %1887 = vmatpush3.bf16.msra.mxu1 %v1884_v26 }
 0x12f   : > { %1853 = vmatprep.subr.bf16.mxu0 %v1852_v31  ;;  %1889 = vmatprep.subr.bf16.mxu1 %v1888_v37 }
 0x132   : > { %1855 = vmatpush3.bf16.msra.mxu0 %v1854_v38  ;;  %1891 = vmatpush3.bf16.msra.mxu1 %v1888_v37 }
 0x133   : > { %1857 = vmatprep.subr.bf16.mxu0 %v1856_v42  ;;  %1893 = vmatprep.subr.bf16.mxu1 %v1892_v49 }
 0x136   : > { %1859 = vmatpush3.bf16.msra.mxu0 %v1858_v50  ;;  %1895 = vmatpush3.bf16.msra.mxu1 %v1892_v49  ;;  %v1900_v49 = vpack.c.bf16 %v1009_v63, %v1008_v60  ;;  %v1010_v50 = vld [vmem:[%s2820_s3 + $0x20] sm:$0xff] }
 0x137   : > { %1861 = vmatprep.subr.bf16.mxu0 %v1860_v54  ;;  %v1903_v53 = vpack.c.bf16 %v1011_v51, %v1010_v50  ;;  %v1012_v54 = vld [vmem:[%s2820_s3 + $0x30] sm:$0xff] }
 0x138   : > { %v1906_v57 = vpack.c.bf16 %v1013_v55, %v1012_v54 }
 0x13a   : > { %1863 = vmatpush3.bf16.msra.mxu0 %v1862_v58  ;;  %v1014_v58 = vld [vmem:[%s2820_s3 + $0x40] sm:$0xff] }
 0x13b   : > { %1896 = vmatprep.subr.bf16.mxu0 %v2029_v45 }
 0x1eb   : > { %v1627_v59 = vpop.f32.mrb[4].mxu1 }
 0x1ec   : > { %v710_v56 = vpop.f32.mrb[5].mxu1 }
 0x1ef   : > { %v1442_v61 = vpop.f32.mrb[8].mxu0 }
 0x1f0   : > { %v1443_v47 = vpop.f32.mrb[9].mxu0  ;;  %v1630_v52 = vpop.f32.mrb[6].mxu1 }
 0x1f1   : > { %v1444_v0 = vadd.f32 %v1443_v47, %v1442_v61  ;;  %v720_v1 = vpop.f32.mrb[7].mxu1  ;;  %v1016_v61 = vld [vmem:[%s2820_s3 + $0x50] sm:$0xff] }
 0x1f3   : > { %v626_v2 = vadd.f32 %v1444_v0, %v1266_v62  ;;  %v1445_v3 = vpop.f32.mrb[10].mxu0  ;;  %v1019_v0 = vld [vmem:[%s2820_s3 + $0x68] sm:$0xff] }
 0x1f4   : > { %v1446_v4 = vpop.f32.mrb[11].mxu0 }
 0x1f5   : > { %v1447_v5 = vadd.f32 %v1446_v4, %v1445_v3  ;;  %v711_v6 = vadd.f32 %v710_v56, %v626_v2  ;;  %v1020_v2 = vld [vmem:[%s2820_s3 + $0x70] sm:$0xff]  ;;  %v1021_v3 = vld [vmem:[%s2820_s3 + $0x78] sm:$0xff]  ;;  %v2031_v4 = vmov 0.0  }
 0x1f7   : > { %v631_v7 = vadd.f32 %v1447_v5, %v1266_v62  ;;  %v1448_v8 = vpop.f32.mrb[12].mxu0  ;;  %v729_v9 = vmax.f32 %v711_v6, 0.0  ;;  %v1918_v5 = vpack.c.bf16 %v1021_v3, %v1020_v2 }
 0x1f8   : > { %v1449_v10 = vpop.f32.mrb[13].mxu0 }
 0x1f9   : > { %v716_v12 = vadd.f32 %v1627_v59, %v631_v7  ;;  %v1450_v13 = vadd.f32 %v1449_v10, %v1448_v8  ;;  %878 = vmatprep.mubr.f32.mxu0 %v729_v9  ;;  %v733_v18 = vrot.slane %v729_v9, 7  ;;  %v745_v20 = vrot.slane %v729_v9, 1  ;;  %v1015_v59 = vld [vmem:[%s2820_s3 + $0x48] sm:$0xff]  ;;  %v1324_v9 = vld [vmem:[%s2819_s2 + $0x2] ss:$0 sm:$0xff] }
 0x1fa   : > { %v1909_v56 = vpack.c.bf16 %v1015_v59, %v1014_v58 }
 0x1fb   : > { %v730_v14 = vmax.f32 %v716_v12, 0.0  ;;  %v636_v15 = vadd.f32 %v1450_v13, %v1266_v62  ;;  %v1451_v17 = vpop.f32.mrb[14].mxu0 }
 0x1fc   : > { %v1452_v19 = vpop.f32.mrb[15].mxu0 }
 0x1fd   : > { %v721_v21 = vadd.f32 %v720_v1, %v636_v15  ;;  %v1453_v22 = vadd.f32 %v1452_v19, %v1451_v17  ;;  %v746_v23 = vrot.slane %v730_v14, 1  ;;  %v734_v24 = vrot.slane %v730_v14, 7 }
 0x1ff   : > { %v731_v26 = vmax.f32 %v721_v21, 0.0  ;;  %v641_v27 = vadd.f32 %v1453_v22, %v1266_v62  ;;  %v751_v28 = vsel %vm240_vm0, %v745_v20, %v746_v23  ;;  %v739_v29 = vsel %vm227_vm1, %v733_v18, %v734_v24  ;;  %v1017_v62 = vld [vmem:[%s2820_s3 + $0x58] sm:$0xff] }
 0x200   : > { %1663 = vmatprep.mubr.f32.mxu1 %v751_v28  ;;  %v1912_v47 = vpack.c.bf16 %v1017_v62, %v1016_v61 }
 0x201   : > { %v747_v30 = vrot.slane %v731_v26, 1  ;;  %v726_v31 = vadd.f32 %v1630_v52, %v641_v27  ;;  %v735_v34 = vrot.slane %v731_v26, 7  ;;  %v1018_v52 = vld [vmem:[%s2820_s3 + $0x60] sm:$0xff] }
 0x202   : > { %v1915_v1 = vpack.c.bf16 %v1019_v0, %v1018_v52 }
 0x203   : > { %v732_v35 = vmax.f32 %v726_v31, 0.0  ;;  %v750_v36 = vsel %vm240_vm0, %v746_v23, %v747_v30  ;;  %v738_v37 = vsel %vm227_vm1, %v734_v24, %v735_v34 }
 0x204   : > { %1664 = vmatmul.mubr.msk.f32.vlgmr.msra.gmra.mrb[8].mxu1 %vm2347_vm3, %v750_v36 }
 0x205   : > { %v736_v38 = vrot.slane %v732_v35, 7  ;;  %v748_v39 = vrot.slane %v732_v35, 1 }
 0x207   : > { %v740_v40 = vsel %vm227_vm1, %v736_v38, %v733_v18  ;;  %v749_v41 = vsel %vm240_vm0, %v747_v30, %v748_v39  ;;  %v752_v42 = vsel %vm240_vm0, %v748_v39, %v745_v20  ;;  %v737_v43 = vsel %vm227_vm1, %v735_v34, %v736_v38 }
 0x208   : > { %1326 = vmatmul.mubr.msk.f32.vlgmr.msra.gmra.mrb[16].mxu0 %vm2320_vm2, %v740_v40  ;;  %1666 = vmatprep.mubr.f32.mxu1 %v749_v41 }
 0x209   : > { %883 = vmatprep.mubr.f32.mxu0 %v730_v14  ;;  %1667 = vmatmul.mubr.msk.f32.gmra.mrb[10].mxu1 %vm2371_vm4, %v752_v42 }
 0x20a   : > { %1898 = vmatpush3.bf16.msra.mxu0 %v1897_v44 }
 0x20b   : > { %1899 = vmatprep.subr.bf16.mxu0 %v2029_v45 }
 0x20c   : > { %884 = vmatmul.mubr.f32.gmra.mrb[18].mxu0 %v739_v29 }
 0x20d   : > { %888 = vmatprep.mubr.f32.mxu0 %v731_v26 }
 0x20e   : > { %1901 = vmatpush3.bf16.msra.mxu0 %v1900_v49 }
 0x20f   : > { %1902 = vmatprep.subr.bf16.mxu0 %v2029_v45 }
 0x210   : > { %1328 = vmatmul.mubr.msk.f32.gmra.mrb[20].mxu0 %vm2378_vm5, %v738_v37 }
 0x211   : > { %893 = vmatprep.mubr.f32.mxu0 %v732_v35 }
 0x212   : > { %1904 = vmatpush3.bf16.msra.mxu0 %v1903_v53 }
 0x213   : > { %1905 = vmatprep.subr.bf16.mxu0 %v2029_v45 }
 0x214   : > { %894 = vmatmul.mubr.f32.gmra.mrb[22].mxu0 %v737_v43 }
 0x215   : > { %1701 = vmatprep.mubr.msk.f32.mxu0 %vm2030_vm6, %v2031_v4 }
 0x216   : > { %1907 = vmatpush3.bf16.msra.mxu0 %v1906_v57  ;;  %v2032_v57 = vmov 1966171168  }
 0x217   : > { %1908 = vmatprep.subr.bf16.mxu0 %v2029_v45 }
 0x21a   : > { %1910 = vmatpush3.bf16.msra.mxu0 %v1909_v56 }
 0x21b   : > { %1911 = vmatprep.subr.bf16.mxu0 %v2029_v45 }
 0x21e   : > { %1913 = vmatpush3.bf16.msra.mxu0 %v1912_v47 }
 0x21f   : > { %1914 = vmatprep.subr.bf16.mxu0 %v2029_v45 }
 0x222   : > { %1916 = vmatpush3.bf16.msra.mxu0 %v1915_v1 }
 0x223   : > { %1917 = vmatprep.subr.bf16.mxu0 %v2029_v45 }
 0x226   : > { %1919 = vmatpush3.bf16.msra.mxu0 %v1918_v5 }
 0x2d7   : > { %v1665_v6 = vpop.f32.mrb[8].mxu1 }
 0x2d8   : > { %v965_v7 = vpop.f32.mrb[9].mxu1 }
 0x2db   : > { %v1506_v8 = vpop.f32.mrb[16].mxu0 }
 0x2dc   : > { %v1507_v10 = vpop.f32.mrb[17].mxu0  ;;  %v1668_v12 = vpop.f32.mrb[10].mxu1 }
 0x2dd   : > { %v1508_v13 = vadd.f32 %v1507_v10, %v1506_v8  ;;  %v975_v14 = vpop.f32.mrb[11].mxu1 }
 0x2df   : > { %v881_v15 = vadd.f32 %v1508_v13, %v1324_v9  ;;  %v1509_v17 = vpop.f32.mrb[18].mxu0 }
 0x2e0   : > { %v1510_v18 = vpop.f32.mrb[19].mxu0 }
 0x2e1   : > { %v966_v19 = vadd.f32 %v965_v7, %v881_v15  ;;  %v1511_v20 = vadd.f32 %v1510_v18, %v1509_v17 }
 0x2e3   : > { %v886_v21 = vadd.f32 %v1511_v20, %v1324_v9  ;;  %v1512_v22 = vpop.f32.mrb[20].mxu0  ;;  %v984_v24 = vadd.f32 %v966_v19, %v2508_v11 }
 0x2e4   : > { %v1513_v23 = vpop.f32.mrb[21].mxu0 }
 0x2e5   : > { %v971_v26 = vadd.f32 %v1665_v6, %v886_v21  ;;  %v1514_v27 = vadd.f32 %v1513_v23, %v1512_v22  ;;  %v988_v34 = vmax.f32 %v984_v24, 0.0 }
 0x2e7   : > { %v985_v28 = vadd.f32 %v971_v26, %v2511_v16  ;;  %v891_v29 = vadd.f32 %v1514_v27, %v1324_v9  ;;  %v1515_v30 = vpop.f32.mrb[22].mxu0 }
 0x2e8   : > { %v1516_v31 = vpop.f32.mrb[23].mxu0 }
 0x2e9   : > { %v989_v35 = vmax.f32 %v985_v28, 0.0  ;;  %v976_v36 = vadd.f32 %v975_v14, %v891_v29  ;;  %v1517_v37 = vadd.f32 %v1516_v31, %v1515_v30 }
 0x2eb   : > { %v992_v38 = vadd.f32 %v989_v35, %v988_v34  ;;  %v896_v39 = vadd.f32 %v1517_v37, %v1324_v9  ;;  %v986_v41 = vadd.f32 %v976_v36, %v2515_v25 }
 0x2ed   : > { %v993_v40 = vrot.slane %v992_v38, 4  ;;  %v981_v42 = vadd.f32 %v1668_v12, %v896_v39  ;;  %v990_v46 = vmax.f32 %v986_v41, 0.0 }
 0x2ef   : > { %v994_v43 = vadd.f32 %v993_v40, %v992_v38  ;;  %v987_v11 = vadd.f32 %v981_v42, %v2526_v32  ;;  %v1099_v32 = vunpack.c.l.s4 %v2032_v57 }
 0x2f1   : > { %v991_v33 = vmax.f32 %v987_v11, 0.0  ;;  %v995_v44 = vrot.slane %v994_v43, 2  ;;  %v1100_v58 = vunpack.c.0.s8 %v1099_v32 }
 0x2f3   : > { %v999_v16 = vadd.f32 %v991_v33, %v990_v46  ;;  %v996_v63 = vadd.f32 %v995_v44, %v994_v43  ;;  %v1103_v59 = vsub.s32 %v1100_v58, %v2220_v48 }
 0x2f5   : > { %v1000_v45 = vrot.slane %v999_v16, 4  ;;  %v997_v50 = vrot.slane %v996_v63, 1 }
 0x2f7   : > { %v1001_v60 = vadd.f32 %v1000_v45, %v999_v16  ;;  %v998_v54 = vadd.f32 %v997_v50, %v996_v63 }
 0x2f9   : > { %v1002_v49 = vrot.slane %v1001_v60, 2 }
 0x2fb   : > { %v1003_v51 = vadd.f32 %v1002_v49, %v1001_v60 }
 0x2fd   : > { %v1004_v53 = vrot.slane %v1003_v51, 1 }
 0x2ff   : > { %v1005_v25 = vadd.f32 %v1004_v53, %v1003_v51 }
 0x301   : > { %v1025_v55 = vsel %vm1024_vm7, %v1005_v25, %v998_v54 }
 0x302   : > { %1702 = vmatmul.mubr.f32.vlgmr.msra.gmra.mrb[24].mxu0 %v1025_v55 }
 0x3d5   : > { %v1093_v56 = vpop.f32.mrb[24].mxu0 }
 0x3d6   : > { %v1104_v61 = vrot.slane %v1093_v56, %v1103_v59  ;;  %v1703_v62 = vpop.f32.mrb[25].mxu0 }
 0x3d8   : > { %v1105_v47 = vcombine.high %v1104_v61, %v1104_v61  ;;  %1333 = vst.sshfl [vmem:[%s193_s23] sm:$0x1 pattern:$0x73625140] %v1104_v61 }
 0x3da   : > { %1334 = vst.sshfl [vmem:[%s193_s23 + $0x1] sm:$0x1 pattern:$0x73625140] %v1105_v47 }
 0x3db   : > { %1978 = shalt.err (!%p1975_p3)
}
 0x3dc   : > { %s1979_s11 = scalar_lea.hbm %s2774_s6, 32  ;;  %s1983_s14 = scalar_lea.hbm %s2821_s4, 64 }
 0x3dd   : > { %p1980_p4 = scmp.ne.s32.totalorder %s2774_s6, %s1979_s11  ;;  %p1984_p9 = scmp.lt.u32.totalorder %s2774_s6, %s2821_s4 }
 0x3de   : > { %p1985_p10 = scmp.lt.u32.totalorder %s1983_s14, %s1979_s11  ;;  %p1987_p12 = scmp.lt.u32.totalorder %s1979_s11, %s2774_s6 }
 0x3df   : > { %p1981_p7 = pnand %p1980_p4, %p2099_p5 }
 0x3e0   : > { %p1986_p11 = por %p1985_p10, %p1984_p9 }
 0x3e1   : > { %p1982_p8 = pneg %p1981_p7 }
 0x3e2   : > { %p1988_p13 = por %p1987_p12, %p1986_p11 }
 0x3e4   : > { %p1989_p0 = pnand %p1988_p13, %p1982_p8 }
 0x3e6   : > { %1992 = shalt.err (!%p1989_p0)
}
 0x3e7   : > { %s2034_s22 = smov 16   ;;  %s2035_s23 = smov 1  }
 0x3e8   : > { %1920 = dma.vmem_to_hbm [thread:$0]  (%p2099_p5), %s2769_s27, 32, %s2774_s6, %s2776_s29, %s2034_s22, %s2034_s22, %s2035_s23  }
 0x3e9 PF: > { %p1926_p1 = scmp.ge.s32.totalorder %s2027_s18, 2  ;;  %s1153_s28 = sand.u32 1, %s2015_s15  }
 0x3ea   : > { %s1154_s30 = scalar_lea.sflag [#allocation3], %s1153_s28 }
 0x3eb   : > { %p1923_p2 = pnand %p1926_p1, %p2103_p6 }
 0x3ed   : > { %2010 = dma.done.wait (!%p1923_p2), %s1154_s30, 32  }
 0x3ee   : > { %2012 = vsyncadd (!%p1923_p2), %s1154_s30, 4294967264  ;;  %p14_p3 = scmp.ge.s32.totalorder %s2086_s21, 4   ;;  %s2833_s15 = smov %s2019_s16 }
 0x3ef   : > { %s2834_s16 = smov %s2023_s17  ;;  %s2835_s17 = smov %s2097_s24 }
 0x3f0   : > { %s2836_s18 = smov %s2086_s21  ;;  %16 = sbr.rel (!%p14_p3) target bundleno = 3 (0x3), region = 75 }
 0x3f7   :  { %1159 = vsyncpa [#allocation3], 1 }
 0x3f8   :  { %1161 = vsyncpa [#allocation3 + $0x1], 1 }

</bundles_post_ra>
